<compile_context>
chip_gen: v7x
topology: tpu7x:2x2x1
jax: 0.10.0
libtpu: 0.0.40
codegen_flags: <defaults>
</compile_context>

<pallas_src>
import functools

import jax
import jax.numpy as jnp
from jax.experimental import pallas as pl
from jax.experimental.pallas import tpu as pltpu

LN_EPS = 1e-5  # PyTorch nn.LayerNorm default eps


def _round_up(v, m):
    return ((v + m - 1) // m) * m


# -----------------------------------------------------------------------------
# Kernel
# -----------------------------------------------------------------------------
def qvalue_kernel(x_ref, w_ref, v_ref, o_ref, *, S, H, A, woffs):
    """Whole QValueNet forward on one batch tile.

    x_ref : (tb, S)      input states
    w_ref : (Kp, Wlane)  packed weight slab (row-stacked, zero padded)
    v_ref : (Nv, Vlane)  packed bias / LayerNorm vectors (one per row)
    o_ref : (tb, A)      output Q-values (true width; masked store is cheap)
    """
    H2, H4 = 2 * H, 4 * H

    def w(name, k, n):
        off = woffs[name]                       # static Python int
        return w_ref[off:off + k, :n]

    def v(row, n):
        return v_ref[row:row + 1, :n]           # (1, n) -> broadcasts over batch

    def lnorm(h, g, b):
        # One-pass LayerNorm: sum(h) and sum(h*h) are independent cross-lane
        # reductions, so the two XLU units can pipeline them.
        inv_n = 1.0 / h.shape[-1]
        s1 = jnp.sum(h, axis=-1, keepdims=True)
        s2 = jnp.sum(h * h, axis=-1, keepdims=True)
        mu = s1 * inv_n
        var = jnp.maximum(s2 * inv_n - mu * mu, 0.0)
        return (h - mu) * jax.lax.rsqrt(var + LN_EPS) * g + b

    def matmul(a, b):
        return jnp.dot(a, b, preferred_element_type=jnp.float32)

    x = x_ref[...].astype(jnp.float32)

    # x = relu(fc1(x))
    h = jnp.maximum(matmul(x, w("fc1", S, H)) + v(0, H), 0.0)

    # ResidualBlock 1 (H -> 2H): fc1 and projection fused into one (H, 4H)
    # matmul; fc1/LN branch occupies the leading lanes, projection the tail.
    z = matmul(h, w("wr1", H, H4)) + v(1, H4)
    out = jnp.maximum(lnorm(z[:, :H2], v(3, H2), v(4, H2)), 0.0)
    res = z[:, H2:H4]                             # projection path
    # dropout(0.1) -> identity (eval mode)
    out = lnorm(matmul(out, w("r1f2", H2, H2)) + v(2, H2), v(5, H2), v(6, H2))
    h = jnp.maximum(out + res, 0.0)

    # ResidualBlock 2 (2H -> H): fc1 and projection fused into one (2H, 2H) matmul.
    z = matmul(h, w("wr2", H2, H2)) + v(7, H2)
    out = jnp.maximum(lnorm(z[:, :H], v(9, H), v(10, H)), 0.0)
    res = z[:, H:H2]
    out = lnorm(matmul(out, w("r2f2", H, H)) + v(8, H), v(11, H), v(12, H))
    h = jnp.maximum(out + res, 0.0)

    # x = relu(layer_norm(fc2(x)))
    h = jnp.maximum(lnorm(matmul(h, w("fc2", H, H)) + v(13, H), v(14, H), v(15, H)), 0.0)

    # fc_out: store at true width A (masked vst; store slot is not the binding
    # unit here, and this avoids 128/A x HBM write inflation).
    o_ref[...] = (matmul(h, w("fco", H, A)) + v(16, A)).astype(o_ref.dtype)


# -----------------------------------------------------------------------------
# Parameter packing (call ONCE per parameter update, not per forward call)
# -----------------------------------------------------------------------------
def pack_params(params):
    """Fuse shared-input matmuls and pack everything into two VMEM slabs."""
    S = int(params["fc1_w"].shape[0])
    H = int(params["fc1_w"].shape[1])
    A = int(params["fco_w"].shape[1])
    H4 = 4 * H
    Wlane = _round_up(max(H4, A), 128)

    def flat(v):
        return jnp.reshape(jnp.asarray(v, jnp.float32), (-1,))

    # Fused weights / biases: projection + fc1 of each residual block share
    # their input.  The fc1/LN branch goes first (lanes 0..) since it feeds
    # more downstream ops; the projection branch takes the trailing lanes.
    wr1 = jnp.concatenate([params["r1f1_w"], params["r1p_w"]], axis=1)       # (H, 4H)
    br1 = jnp.concatenate([flat(params["r1f1_b"]), flat(params["r1p_b"])])   # (4H,)
    wr2 = jnp.concatenate([params["r2f1_w"], params["r2p_w"]], axis=1)       # (2H, 2H)
    br2 = jnp.concatenate([flat(params["r2f1_b"]), flat(params["r2p_b"])])   # (2H,)

    weights = [
        ("fc1", params["fc1_w"]),    # (S, H)
        ("wr1", wr1),                # (H, 4H)
        ("r1f2", params["r1f2_w"]),  # (2H, 2H)
        ("wr2", wr2),                # (2H, 2H)
        ("r2f2", params["r2f2_w"]),  # (H, H)
        ("fc2", params["fc2_w"]),    # (H, H)
        ("fco", params["fco_w"]),    # (H, A)
    ]
    blocks, woffs, off = [], {}, 0
    for name, wt in weights:
        wt = jnp.asarray(wt, jnp.float32)
        k, n = int(wt.shape[0]), int(wt.shape[1])
        kp = _round_up(k, 8)
        blk = jnp.zeros((kp, Wlane), jnp.float32).at[:k, :n].set(wt)
        blocks.append(blk)
        woffs[name] = off
        off += kp
    w_slab = jnp.concatenate(blocks, axis=0)

    vecs = [
        flat(params["fc1_b"]),                                   # 0
        br1,                                                     # 1
        flat(params["r1f2_b"]),                                  # 2
        flat(params["r1ln1_g"]), flat(params["r1ln1_b"]),        # 3, 4
        flat(params["r1ln2_g"]), flat(params["r1ln2_b"]),        # 5, 6
        br2,                                                     # 7
        flat(params["r2f2_b"]),                                  # 8
        flat(params["r2ln1_g"]), flat(params["r2ln1_b"]),        # 9, 10
        flat(params["r2ln2_g"]), flat(params["r2ln2_b"]),        # 11, 12
        flat(params["fc2_b"]),                                   # 13
        flat(params["ln_g"]), flat(params["ln_b"]),              # 14, 15
        flat(params["fco_b"]),                                   # 16
    ]
    Vlane = _round_up(max(128, max(int(v.shape[0]) for v in vecs)), 128)
    nrow = _round_up(len(vecs), 8)
    v_slab = jnp.zeros((nrow, Vlane), jnp.float32)
    for i, vv in enumerate(vecs):
        v_slab = v_slab.at[i, : vv.shape[0]].set(vv)

    cfg = dict(S=S, H=H, A=A, woffs=woffs)
    return w_slab, v_slab, cfg


# -----------------------------------------------------------------------------
# Batch tiling
# -----------------------------------------------------------------------------
_TILE_CAP = 1024   # max rows per batch tile: activations are a few MiB, far under VMEM
_MIN_SPLIT = 256   # once B exceeds this, prefer >=2 balanced grid steps (v7x: 2 TCs)


def _choose_batch_tile(B):
    if B <= _MIN_SPLIT:
        return _round_up(B, 8)
    steps = max(2, -(-B // _TILE_CAP))            # >=2 steps, each <= _TILE_CAP rows
    return min(_TILE_CAP, _round_up(-(-B // steps), 8))


# -----------------------------------------------------------------------------
# Pallas wrapper (slabs are packed by the caller, once)
# -----------------------------------------------------------------------------
def qvalue_net_forward(x, w_slab, v_slab, cfg):
    B, S = x.shape
    assert S == cfg["S"]
    A = cfg["A"]

    tb = _choose_batch_tile(B)
    grid = (pl.cdiv(B, tb),)   # ragged last block: reads padded, writes masked

    kernel = functools.partial(qvalue_kernel, **cfg)

    return pl.pallas_call(
        kernel,
        out_shape=jax.ShapeDtypeStruct((B, A), jnp.float32),
        grid_spec=pltpu.PrefetchScalarGridSpec(
            num_scalar_prefetch=0,
            grid=grid,
            in_specs=[
                pl.BlockSpec((tb, S), lambda i: (i, 0)),
                # Weight / vector slabs: constant block index -> resident
                # across all batch tiles, DMA'd once.
                # TODO(synk): pipeline_mode=pl.Buffered(1) would halve their
                # footprint; irrelevant at ~150 KB, revisit if hidden scales.
                pl.BlockSpec(w_slab.shape, lambda i: (0, 0)),
                pl.BlockSpec(v_slab.shape, lambda i: (0, 0)),
            ],
            out_specs=pl.BlockSpec((tb, A), lambda i: (i, 0)),
        ),
        compiler_params=pltpu.CompilerParams(
            dimension_semantics=("parallel",),
            vmem_limit_bytes=32 * 1024 * 1024,  # few-MiB footprint + headroom (v7x safe)
        ),
    )(x, w_slab, v_slab)


# -----------------------------------------------------------------------------
# Deterministic init + pure-JAX reference (sanity check)
# -----------------------------------------------------------------------------
def make_params(key, state_size, action_size, hidden_size):
    """Mirrors QValueNet._init_weights: orthogonal(gain=sqrt(2)) weights,
    zero biases, fc_out weight *= 0.01, LayerNorm gamma=1 / beta=0."""
    H = hidden_size
    ortho = jax.nn.initializers.orthogonal(scale=float(jnp.sqrt(2.0)))
    keys = iter(jax.random.split(key, 16))

    def lin(in_dim, out_dim, extra_scale=1.0):
        # PyTorch weight shape is (out, in); init there, then transpose.
        w = ortho(next(keys), (out_dim, in_dim), jnp.float32) * extra_scale
        return jnp.asarray(w).T, jnp.zeros((1, out_dim), jnp.float32)

    def ln(dim):
        return jnp.ones((1, dim), jnp.float32), jnp.zeros((1, dim), jnp.float32)

    p = {}
    p["fc1_w"], p["fc1_b"] = lin(state_size, H)
    # ResidualBlock 1 (H -> 2H)
    p["r1p_w"], p["r1p_b"] = lin(H, 2 * H)
    p["r1f1_w"], p["r1f1_b"] = lin(H, 2 * H)
    p["r1f2_w"], p["r1f2_b"] = lin(2 * H, 2 * H)
    p["r1ln1_g"], p["r1ln1_b"] = ln(2 * H)
    p["r1ln2_g"], p["r1ln2_b"] = ln(2 * H)
    # ResidualBlock 2 (2H -> H)
    p["r2p_w"], p["r2p_b"] = lin(2 * H, H)
    p["r2f1_w"], p["r2f1_b"] = lin(2 * H, H)
    p["r2f2_w"], p["r2f2_b"] = lin(H, H)
    p["r2ln1_g"], p["r2ln1_b"] = ln(H)
    p["r2ln2_g"], p["r2ln2_b"] = ln(H)
    # trunk tail
    p["fc2_w"], p["fc2_b"] = lin(H, H)
    p["ln_g"], p["ln_b"] = ln(H)
    p["fco_w"], p["fco_b"] = lin(H, action_size, extra_scale=0.01)
    return p


def reference_forward(x, p):
    def lnorm(h, g, b):
        mu = h.mean(-1, keepdims=True)
        var = jnp.square(h - mu).mean(-1, keepdims=True)
        return (h - mu) / jnp.sqrt(var + LN_EPS) * g + b

    h = jax.nn.relu(x @ p["fc1_w"] + p["fc1_b"])
    res = h @ p["r1p_w"] + p["r1p_b"]
    out = jax.nn.relu(lnorm(h @ p["r1f1_w"] + p["r1f1_b"], p["r1ln1_g"], p["r1ln1_b"]))
    out = lnorm(out @ p["r1f2_w"] + p["r1f2_b"], p["r1ln2_g"], p["r1ln2_b"])
    h = jax.nn.relu(out + res)
    res = h @ p["r2p_w"] + p["r2p_b"]
    out = jax.nn.relu(lnorm(h @ p["r2f1_w"] + p["r2f1_b"], p["r2ln1_g"], p["r2ln1_b"]))
    out = lnorm(out @ p["r2f2_w"] + p["r2f2_b"], p["r2ln2_g"], p["r2ln2_b"])
    h = jax.nn.relu(out + res)
    h = jax.nn.relu(lnorm(h @ p["fc2_w"] + p["fc2_b"], p["ln_g"], p["ln_b"]))
    return h @ p["fco_w"] + p["fco_b"]


if __name__ == "__main__":
    # Small shapes consistent with the module: state vector -> Q-values.
    batch, state_size, action_size, hidden_size = 16, 8, 4, 32

    key = jax.random.PRNGKey(0)
    k_params, k_x = jax.random.split(key)
    params = make_params(k_params, state_size, action_size, hidden_size)
    x = jax.random.normal(k_x, (batch, state_size), dtype=jnp.float32)

    # Pack parameters ONCE (hoisted out of the per-call path; only re-run on a
    # parameter update), then reuse the two slabs for every forward call.
    w_slab, v_slab, cfg = pack_params(params)
    w_slab, v_slab = jax.block_until_ready((w_slab, v_slab))
    forward = jax.jit(lambda xx, ws, vs: qvalue_net_forward(xx, ws, vs, cfg))

    out = forward(x, w_slab, v_slab)
    out = jax.block_until_ready(out)

    ref = reference_forward(x, params)
    assert out.shape == (batch, action_size)
    err = float(jnp.max(jnp.abs(out - ref)))
    assert jnp.allclose(out, ref, atol=2e-3, rtol=2e-3), err

    print("KERNEL_OK")
</pallas_src>

<mosaic_0001>
module attributes {stable_mosaic.version = 11 : i64} {
  func.func @qvalue_kernel(%arg0: i32, %arg1: memref<16x8xf32, #tpu.memory_space<vmem>>, %arg2: memref<264x128xf32, #tpu.memory_space<vmem>>, %arg3: memref<24x128xf32, #tpu.memory_space<vmem>>, %arg4: memref<16x4xf32, #tpu.memory_space<vmem>>) attributes {dimension_semantics = [#tpu.dimension_semantics<parallel>], iteration_bounds = array<i64: 1>, scalar_prefetch = 0 : i64, scratch_operands = 0 : i64, tpu.core_type = #tpu.core_type<tc>, window_params = [{transform_indices = @transform_0, window_bounds = array<i64: 16, 8>}, {pipeline_mode = #tpu.pipeline_mode<synchronous>, transform_indices = @transform_1, window_bounds = array<i64: 264, 128>}, {pipeline_mode = #tpu.pipeline_mode<synchronous>, transform_indices = @transform_2, window_bounds = array<i64: 24, 128>}, {transform_indices = @transform_3, window_bounds = array<i64: 16, 4>}]} {
    %c0 = arith.constant 0 : index
    %c0_0 = arith.constant 0 : index
    %0 = vector.load %arg1[%c0, %c0_0] : memref<16x8xf32, #tpu.memory_space<vmem>>, vector<16x8xf32>
    %c0_1 = arith.constant 0 : index
    %c0_2 = arith.constant 0 : index
    %1 = vector.load %arg2[%c0_1, %c0_2] : memref<264x128xf32, #tpu.memory_space<vmem>>, vector<8x32xf32>
    %cst = arith.constant dense<0.000000e+00> : vector<16x32xf32>
    %2 = tpu.matmul %0, %1, %cst {dimension_numbers = #tpu.dot_dimension_numbers<[1], [0], [0], [1], [0, 0, 1, 1], [], []>} : vector<16x8xf32>, vector<8x32xf32>, vector<16x32xf32> -> vector<16x32xf32>
    %c0_3 = arith.constant 0 : index
    %c0_4 = arith.constant 0 : index
    %3 = vector.load %arg3[%c0_3, %c0_4] : memref<24x128xf32, #tpu.memory_space<vmem>>, vector<1x32xf32>
    %4 = vector.broadcast %3 : vector<1x32xf32> to vector<16x32xf32>
    %5 = arith.addf %2, %4 : vector<16x32xf32>
    %cst_5 = arith.constant 0.000000e+00 : f32
    %6 = vector.broadcast %cst_5 : f32 to vector<16x32xf32>
    %7 = arith.maximumf %5, %6 : vector<16x32xf32>
    %c8 = arith.constant 8 : index
    %c0_6 = arith.constant 0 : index
    %8 = vector.load %arg2[%c8, %c0_6] : memref<264x128xf32, #tpu.memory_space<vmem>>, vector<32x128xf32>
    %cst_7 = arith.constant dense<0.000000e+00> : vector<16x128xf32>
    %9 = tpu.matmul %7, %8, %cst_7 {dimension_numbers = #tpu.dot_dimension_numbers<[1], [0], [0], [1], [0, 0, 1, 1], [], []>} : vector<16x32xf32>, vector<32x128xf32>, vector<16x128xf32> -> vector<16x128xf32>
    %c1 = arith.constant 1 : index
    %c0_8 = arith.constant 0 : index
    %10 = vector.load %arg3[%c1, %c0_8] : memref<24x128xf32, #tpu.memory_space<vmem>>, vector<1x128xf32>
    %11 = vector.broadcast %10 : vector<1x128xf32> to vector<16x128xf32>
    %12 = arith.addf %9, %11 : vector<16x128xf32>
    %13 = vector.extract_strided_slice %12 {offsets = [0, 0], sizes = [16, 64], strides = [1, 1]} : vector<16x128xf32> to vector<16x64xf32>
    %c3 = arith.constant 3 : index
    %c0_9 = arith.constant 0 : index
    %14 = vector.load %arg3[%c3, %c0_9] : memref<24x128xf32, #tpu.memory_space<vmem>>, vector<1x64xf32>
    %c4 = arith.constant 4 : index
    %c0_10 = arith.constant 0 : index
    %15 = vector.load %arg3[%c4, %c0_10] : memref<24x128xf32, #tpu.memory_space<vmem>>, vector<1x64xf32>
    %cst_11 = arith.constant dense<0.000000e+00> : vector<16xf32>
    %16 = vector.multi_reduction <add>, %13, %cst_11 [1] : vector<16x64xf32> to vector<16xf32>
    %17 = vector.shape_cast %16 : vector<16xf32> to vector<16x1xf32>
    %18 = arith.mulf %13, %13 : vector<16x64xf32>
    %cst_12 = arith.constant dense<0.000000e+00> : vector<16xf32>
    %19 = vector.multi_reduction <add>, %18, %cst_12 [1] : vector<16x64xf32> to vector<16xf32>
    %20 = vector.shape_cast %19 : vector<16xf32> to vector<16x1xf32>
    %cst_13 = arith.constant 1.562500e-02 : f32
    %21 = vector.broadcast %cst_13 : f32 to vector<16x1xf32>
    %22 = arith.mulf %17, %21 : vector<16x1xf32>
    %cst_14 = arith.constant 1.562500e-02 : f32
    %23 = vector.broadcast %cst_14 : f32 to vector<16x1xf32>
    %24 = arith.mulf %20, %23 : vector<16x1xf32>
    %25 = arith.mulf %22, %22 : vector<16x1xf32>
    %26 = arith.subf %24, %25 : vector<16x1xf32>
    %cst_15 = arith.constant 0.000000e+00 : f32
    %27 = vector.broadcast %cst_15 : f32 to vector<16x1xf32>
    %28 = arith.maximumf %26, %27 : vector<16x1xf32>
    %29 = vector.broadcast %22 : vector<16x1xf32> to vector<16x64xf32>
    %30 = arith.subf %13, %29 : vector<16x64xf32>
    %cst_16 = arith.constant 9.99999974E-6 : f32
    %31 = vector.broadcast %cst_16 : f32 to vector<16x1xf32>
    %32 = arith.addf %28, %31 : vector<16x1xf32>
    %33 = math.rsqrt %32 : vector<16x1xf32>
    %34 = vector.broadcast %33 : vector<16x1xf32> to vector<16x64xf32>
    %35 = arith.mulf %30, %34 : vector<16x64xf32>
    %36 = vector.broadcast %14 : vector<1x64xf32> to vector<16x64xf32>
    %37 = arith.mulf %35, %36 : vector<16x64xf32>
    %38 = vector.broadcast %15 : vector<1x64xf32> to vector<16x64xf32>
    %39 = arith.addf %37, %38 : vector<16x64xf32>
    %cst_17 = arith.constant 0.000000e+00 : f32
    %40 = vector.broadcast %cst_17 : f32 to vector<16x64xf32>
    %41 = arith.maximumf %39, %40 : vector<16x64xf32>
    %42 = vector.extract_strided_slice %12 {offsets = [0, 64], sizes = [16, 64], strides = [1, 1]} : vector<16x128xf32> to vector<16x64xf32>
    %c40 = arith.constant 40 : index
    %c0_18 = arith.constant 0 : index
    %43 = vector.load %arg2[%c40, %c0_18] : memref<264x128xf32, #tpu.memory_space<vmem>>, vector<64x64xf32>
    %cst_19 = arith.constant dense<0.000000e+00> : vector<16x64xf32>
    %44 = tpu.matmul %41, %43, %cst_19 {dimension_numbers = #tpu.dot_dimension_numbers<[1], [0], [0], [1], [0, 0, 1, 1], [], []>} : vector<16x64xf32>, vector<64x64xf32>, vector<16x64xf32> -> vector<16x64xf32>
    %c2 = arith.constant 2 : index
    %c0_20 = arith.constant 0 : index
    %45 = vector.load %arg3[%c2, %c0_20] : memref<24x128xf32, #tpu.memory_space<vmem>>, vector<1x64xf32>
    %46 = vector.broadcast %45 : vector<1x64xf32> to vector<16x64xf32>
    %47 = arith.addf %44, %46 : vector<16x64xf32>
    %c5 = arith.constant 5 : index
    %c0_21 = arith.constant 0 : index
    %48 = vector.load %arg3[%c5, %c0_21] : memref<24x128xf32, #tpu.memory_space<vmem>>, vector<1x64xf32>
    %c6 = arith.constant 6 : index
    %c0_22 = arith.constant 0 : index
    %49 = vector.load %arg3[%c6, %c0_22] : memref<24x128xf32, #tpu.memory_space<vmem>>, vector<1x64xf32>
    %cst_23 = arith.constant dense<0.000000e+00> : vector<16xf32>
    %50 = vector.multi_reduction <add>, %47, %cst_23 [1] : vector<16x64xf32> to vector<16xf32>
    %51 = vector.shape_cast %50 : vector<16xf32> to vector<16x1xf32>
    %52 = arith.mulf %47, %47 : vector<16x64xf32>
    %cst_24 = arith.constant dense<0.000000e+00> : vector<16xf32>
    %53 = vector.multi_reduction <add>, %52, %cst_24 [1] : vector<16x64xf32> to vector<16xf32>
    %54 = vector.shape_cast %53 : vector<16xf32> to vector<16x1xf32>
    %cst_25 = arith.constant 1.562500e-02 : f32
    %55 = vector.broadcast %cst_25 : f32 to vector<16x1xf32>
    %56 = arith.mulf %51, %55 : vector<16x1xf32>
    %cst_26 = arith.constant 1.562500e-02 : f32
    %57 = vector.broadcast %cst_26 : f32 to vector<16x1xf32>
    %58 = arith.mulf %54, %57 : vector<16x1xf32>
    %59 = arith.mulf %56, %56 : vector<16x1xf32>
    %60 = arith.subf %58, %59 : vector<16x1xf32>
    %cst_27 = arith.constant 0.000000e+00 : f32
    %61 = vector.broadcast %cst_27 : f32 to vector<16x1xf32>
    %62 = arith.maximumf %60, %61 : vector<16x1xf32>
    %63 = vector.broadcast %56 : vector<16x1xf32> to vector<16x64xf32>
    %64 = arith.subf %47, %63 : vector<16x64xf32>
    %cst_28 = arith.constant 9.99999974E-6 : f32
    %65 = vector.broadcast %cst_28 : f32 to vector<16x1xf32>
    %66 = arith.addf %62, %65 : vector<16x1xf32>
    %67 = math.rsqrt %66 : vector<16x1xf32>
    %68 = vector.broadcast %67 : vector<16x1xf32> to vector<16x64xf32>
    %69 = arith.mulf %64, %68 : vector<16x64xf32>
    %70 = vector.broadcast %48 : vector<1x64xf32> to vector<16x64xf32>
    %71 = arith.mulf %69, %70 : vector<16x64xf32>
    %72 = vector.broadcast %49 : vector<1x64xf32> to vector<16x64xf32>
    %73 = arith.addf %71, %72 : vector<16x64xf32>
    %74 = arith.addf %73, %42 : vector<16x64xf32>
    %cst_29 = arith.constant 0.000000e+00 : f32
    %75 = vector.broadcast %cst_29 : f32 to vector<16x64xf32>
    %76 = arith.maximumf %74, %75 : vector<16x64xf32>
    %c104 = arith.constant 104 : index
    %c0_30 = arith.constant 0 : index
    %77 = vector.load %arg2[%c104, %c0_30] : memref<264x128xf32, #tpu.memory_space<vmem>>, vector<64x64xf32>
    %cst_31 = arith.constant dense<0.000000e+00> : vector<16x64xf32>
    %78 = tpu.matmul %76, %77, %cst_31 {dimension_numbers = #tpu.dot_dimension_numbers<[1], [0], [0], [1], [0, 0, 1, 1], [], []>} : vector<16x64xf32>, vector<64x64xf32>, vector<16x64xf32> -> vector<16x64xf32>
    %c7 = arith.constant 7 : index
    %c0_32 = arith.constant 0 : index
    %79 = vector.load %arg3[%c7, %c0_32] : memref<24x128xf32, #tpu.memory_space<vmem>>, vector<1x64xf32>
    %80 = vector.broadcast %79 : vector<1x64xf32> to vector<16x64xf32>
    %81 = arith.addf %78, %80 : vector<16x64xf32>
    %82 = vector.extract_strided_slice %81 {offsets = [0, 0], sizes = [16, 32], strides = [1, 1]} : vector<16x64xf32> to vector<16x32xf32>
    %c9 = arith.constant 9 : index
    %c0_33 = arith.constant 0 : index
    %83 = vector.load %arg3[%c9, %c0_33] : memref<24x128xf32, #tpu.memory_space<vmem>>, vector<1x32xf32>
    %c10 = arith.constant 10 : index
    %c0_34 = arith.constant 0 : index
    %84 = vector.load %arg3[%c10, %c0_34] : memref<24x128xf32, #tpu.memory_space<vmem>>, vector<1x32xf32>
    %cst_35 = arith.constant dense<0.000000e+00> : vector<16xf32>
    %85 = vector.multi_reduction <add>, %82, %cst_35 [1] : vector<16x32xf32> to vector<16xf32>
    %86 = vector.shape_cast %85 : vector<16xf32> to vector<16x1xf32>
    %87 = arith.mulf %82, %82 : vector<16x32xf32>
    %cst_36 = arith.constant dense<0.000000e+00> : vector<16xf32>
    %88 = vector.multi_reduction <add>, %87, %cst_36 [1] : vector<16x32xf32> to vector<16xf32>
    %89 = vector.shape_cast %88 : vector<16xf32> to vector<16x1xf32>
    %cst_37 = arith.constant 3.125000e-02 : f32
    %90 = vector.broadcast %cst_37 : f32 to vector<16x1xf32>
    %91 = arith.mulf %86, %90 : vector<16x1xf32>
    %cst_38 = arith.constant 3.125000e-02 : f32
    %92 = vector.broadcast %cst_38 : f32 to vector<16x1xf32>
    %93 = arith.mulf %89, %92 : vector<16x1xf32>
    %94 = arith.mulf %91, %91 : vector<16x1xf32>
    %95 = arith.subf %93, %94 : vector<16x1xf32>
    %cst_39 = arith.constant 0.000000e+00 : f32
    %96 = vector.broadcast %cst_39 : f32 to vector<16x1xf32>
    %97 = arith.maximumf %95, %96 : vector<16x1xf32>
    %98 = vector.broadcast %91 : vector<16x1xf32> to vector<16x32xf32>
    %99 = arith.subf %82, %98 : vector<16x32xf32>
    %cst_40 = arith.constant 9.99999974E-6 : f32
    %100 = vector.broadcast %cst_40 : f32 to vector<16x1xf32>
    %101 = arith.addf %97, %100 : vector<16x1xf32>
    %102 = math.rsqrt %101 : vector<16x1xf32>
    %103 = vector.broadcast %102 : vector<16x1xf32> to vector<16x32xf32>
    %104 = arith.mulf %99, %103 : vector<16x32xf32>
    %105 = vector.broadcast %83 : vector<1x32xf32> to vector<16x32xf32>
    %106 = arith.mulf %104, %105 : vector<16x32xf32>
    %107 = vector.broadcast %84 : vector<1x32xf32> to vector<16x32xf32>
    %108 = arith.addf %106, %107 : vector<16x32xf32>
    %cst_41 = arith.constant 0.000000e+00 : f32
    %109 = vector.broadcast %cst_41 : f32 to vector<16x32xf32>
    %110 = arith.maximumf %108, %109 : vector<16x32xf32>
    %111 = vector.extract_strided_slice %81 {offsets = [0, 32], sizes = [16, 32], strides = [1, 1]} : vector<16x64xf32> to vector<16x32xf32>
    %c168 = arith.constant 168 : index
    %c0_42 = arith.constant 0 : index
    %112 = vector.load %arg2[%c168, %c0_42] : memref<264x128xf32, #tpu.memory_space<vmem>>, vector<32x32xf32>
    %cst_43 = arith.constant dense<0.000000e+00> : vector<16x32xf32>
    %113 = tpu.matmul %110, %112, %cst_43 {dimension_numbers = #tpu.dot_dimension_numbers<[1], [0], [0], [1], [0, 0, 1, 1], [], []>} : vector<16x32xf32>, vector<32x32xf32>, vector<16x32xf32> -> vector<16x32xf32>
    %c8_44 = arith.constant 8 : index
    %c0_45 = arith.constant 0 : index
    %114 = vector.load %arg3[%c8_44, %c0_45] : memref<24x128xf32, #tpu.memory_space<vmem>>, vector<1x32xf32>
    %115 = vector.broadcast %114 : vector<1x32xf32> to vector<16x32xf32>
    %116 = arith.addf %113, %115 : vector<16x32xf32>
    %c11 = arith.constant 11 : index
    %c0_46 = arith.constant 0 : index
    %117 = vector.load %arg3[%c11, %c0_46] : memref<24x128xf32, #tpu.memory_space<vmem>>, vector<1x32xf32>
    %c12 = arith.constant 12 : index
    %c0_47 = arith.constant 0 : index
    %118 = vector.load %arg3[%c12, %c0_47] : memref<24x128xf32, #tpu.memory_space<vmem>>, vector<1x32xf32>
    %cst_48 = arith.constant dense<0.000000e+00> : vector<16xf32>
    %119 = vector.multi_reduction <add>, %116, %cst_48 [1] : vector<16x32xf32> to vector<16xf32>
    %120 = vector.shape_cast %119 : vector<16xf32> to vector<16x1xf32>
    %121 = arith.mulf %116, %116 : vector<16x32xf32>
    %cst_49 = arith.constant dense<0.000000e+00> : vector<16xf32>
    %122 = vector.multi_reduction <add>, %121, %cst_49 [1] : vector<16x32xf32> to vector<16xf32>
    %123 = vector.shape_cast %122 : vector<16xf32> to vector<16x1xf32>
    %cst_50 = arith.constant 3.125000e-02 : f32
    %124 = vector.broadcast %cst_50 : f32 to vector<16x1xf32>
    %125 = arith.mulf %120, %124 : vector<16x1xf32>
    %cst_51 = arith.constant 3.125000e-02 : f32
    %126 = vector.broadcast %cst_51 : f32 to vector<16x1xf32>
    %127 = arith.mulf %123, %126 : vector<16x1xf32>
    %128 = arith.mulf %125, %125 : vector<16x1xf32>
    %129 = arith.subf %127, %128 : vector<16x1xf32>
    %cst_52 = arith.constant 0.000000e+00 : f32
    %130 = vector.broadcast %cst_52 : f32 to vector<16x1xf32>
    %131 = arith.maximumf %129, %130 : vector<16x1xf32>
    %132 = vector.broadcast %125 : vector<16x1xf32> to vector<16x32xf32>
    %133 = arith.subf %116, %132 : vector<16x32xf32>
    %cst_53 = arith.constant 9.99999974E-6 : f32
    %134 = vector.broadcast %cst_53 : f32 to vector<16x1xf32>
    %135 = arith.addf %131, %134 : vector<16x1xf32>
    %136 = math.rsqrt %135 : vector<16x1xf32>
    %137 = vector.broadcast %136 : vector<16x1xf32> to vector<16x32xf32>
    %138 = arith.mulf %133, %137 : vector<16x32xf32>
    %139 = vector.broadcast %117 : vector<1x32xf32> to vector<16x32xf32>
    %140 = arith.mulf %138, %139 : vector<16x32xf32>
    %141 = vector.broadcast %118 : vector<1x32xf32> to vector<16x32xf32>
    %142 = arith.addf %140, %141 : vector<16x32xf32>
    %143 = arith.addf %142, %111 : vector<16x32xf32>
    %cst_54 = arith.constant 0.000000e+00 : f32
    %144 = vector.broadcast %cst_54 : f32 to vector<16x32xf32>
    %145 = arith.maximumf %143, %144 : vector<16x32xf32>
    %c200 = arith.constant 200 : index
    %c0_55 = arith.constant 0 : index
    %146 = vector.load %arg2[%c200, %c0_55] : memref<264x128xf32, #tpu.memory_space<vmem>>, vector<32x32xf32>
    %cst_56 = arith.constant dense<0.000000e+00> : vector<16x32xf32>
    %147 = tpu.matmul %145, %146, %cst_56 {dimension_numbers = #tpu.dot_dimension_numbers<[1], [0], [0], [1], [0, 0, 1, 1], [], []>} : vector<16x32xf32>, vector<32x32xf32>, vector<16x32xf32> -> vector<16x32xf32>
    %c13 = arith.constant 13 : index
    %c0_57 = arith.constant 0 : index
    %148 = vector.load %arg3[%c13, %c0_57] : memref<24x128xf32, #tpu.memory_space<vmem>>, vector<1x32xf32>
    %149 = vector.broadcast %148 : vector<1x32xf32> to vector<16x32xf32>
    %150 = arith.addf %147, %149 : vector<16x32xf32>
    %c14 = arith.constant 14 : index
    %c0_58 = arith.constant 0 : index
    %151 = vector.load %arg3[%c14, %c0_58] : memref<24x128xf32, #tpu.memory_space<vmem>>, vector<1x32xf32>
    %c15 = arith.constant 15 : index
    %c0_59 = arith.constant 0 : index
    %152 = vector.load %arg3[%c15, %c0_59] : memref<24x128xf32, #tpu.memory_space<vmem>>, vector<1x32xf32>
    %cst_60 = arith.constant dense<0.000000e+00> : vector<16xf32>
    %153 = vector.multi_reduction <add>, %150, %cst_60 [1] : vector<16x32xf32> to vector<16xf32>
    %154 = vector.shape_cast %153 : vector<16xf32> to vector<16x1xf32>
    %155 = arith.mulf %150, %150 : vector<16x32xf32>
    %cst_61 = arith.constant dense<0.000000e+00> : vector<16xf32>
    %156 = vector.multi_reduction <add>, %155, %cst_61 [1] : vector<16x32xf32> to vector<16xf32>
    %157 = vector.shape_cast %156 : vector<16xf32> to vector<16x1xf32>
    %cst_62 = arith.constant 3.125000e-02 : f32
    %158 = vector.broadcast %cst_62 : f32 to vector<16x1xf32>
    %159 = arith.mulf %154, %158 : vector<16x1xf32>
    %cst_63 = arith.constant 3.125000e-02 : f32
    %160 = vector.broadcast %cst_63 : f32 to vector<16x1xf32>
    %161 = arith.mulf %157, %160 : vector<16x1xf32>
    %162 = arith.mulf %159, %159 : vector<16x1xf32>
    %163 = arith.subf %161, %162 : vector<16x1xf32>
    %cst_64 = arith.constant 0.000000e+00 : f32
    %164 = vector.broadcast %cst_64 : f32 to vector<16x1xf32>
    %165 = arith.maximumf %163, %164 : vector<16x1xf32>
    %166 = vector.broadcast %159 : vector<16x1xf32> to vector<16x32xf32>
    %167 = arith.subf %150, %166 : vector<16x32xf32>
    %cst_65 = arith.constant 9.99999974E-6 : f32
    %168 = vector.broadcast %cst_65 : f32 to vector<16x1xf32>
    %169 = arith.addf %165, %168 : vector<16x1xf32>
    %170 = math.rsqrt %169 : vector<16x1xf32>
    %171 = vector.broadcast %170 : vector<16x1xf32> to vector<16x32xf32>
    %172 = arith.mulf %167, %171 : vector<16x32xf32>
    %173 = vector.broadcast %151 : vector<1x32xf32> to vector<16x32xf32>
    %174 = arith.mulf %172, %173 : vector<16x32xf32>
    %175 = vector.broadcast %152 : vector<1x32xf32> to vector<16x32xf32>
    %176 = arith.addf %174, %175 : vector<16x32xf32>
    %cst_66 = arith.constant 0.000000e+00 : f32
    %177 = vector.broadcast %cst_66 : f32 to vector<16x32xf32>
    %178 = arith.maximumf %176, %177 : vector<16x32xf32>
    %c232 = arith.constant 232 : index
    %c0_67 = arith.constant 0 : index
    %179 = vector.load %arg2[%c232, %c0_67] : memref<264x128xf32, #tpu.memory_space<vmem>>, vector<32x4xf32>
    %cst_68 = arith.constant dense<0.000000e+00> : vector<16x4xf32>
    %180 = tpu.matmul %178, %179, %cst_68 {dimension_numbers = #tpu.dot_dimension_numbers<[1], [0], [0], [1], [0, 0, 1, 1], [], []>} : vector<16x32xf32>, vector<32x4xf32>, vector<16x4xf32> -> vector<16x4xf32>
    %c16 = arith.constant 16 : index
    %c0_69 = arith.constant 0 : index
    %181 = vector.load %arg3[%c16, %c0_69] : memref<24x128xf32, #tpu.memory_space<vmem>>, vector<1x4xf32>
    %182 = vector.broadcast %181 : vector<1x4xf32> to vector<16x4xf32>
    %183 = arith.addf %180, %182 : vector<16x4xf32>
    %c0_70 = arith.constant 0 : index
    %c0_71 = arith.constant 0 : index
    %184 = vector.load %arg4[%c0_70, %c0_71] : memref<16x4xf32, #tpu.memory_space<vmem>>, vector<16x4xf32>
    tpu.vector_store %arg4[%c0_70, %c0_71], %183 {strides = array<i32>} : memref<16x4xf32, #tpu.memory_space<vmem>>, vector<16x4xf32>,
    return
  }
  func.func @transform_0(%arg0: i32) -> (i32, i32) {
    %c0_i32 = arith.constant 0 : i32
    %c0_i32_0 = arith.constant 0 : i32
    return %arg0, %c0_i32 : i32, i32
  }
  func.func @transform_1(%arg0: i32) -> (i32, i32) {
    %c0_i32 = arith.constant 0 : i32
    %c0_i32_0 = arith.constant 0 : i32
    %c0_i32_1 = arith.constant 0 : i32
    return %c0_i32, %c0_i32_0 : i32, i32
  }
  func.func @transform_2(%arg0: i32) -> (i32, i32) {
    %c0_i32 = arith.constant 0 : i32
    %c0_i32_0 = arith.constant 0 : i32
    %c0_i32_1 = arith.constant 0 : i32
    return %c0_i32, %c0_i32_0 : i32, i32
  }
  func.func @transform_3(%arg0: i32) -> (i32, i32) {
    %c0_i32 = arith.constant 0 : i32
    %c0_i32_0 = arith.constant 0 : i32
    return %arg0, %c0_i32 : i32, i32
  }
}

</mosaic_0001>

<bundles_post_ra>
// kernel: _lambda_.1
= control target key start
LH: loop header
LB: loop body
LE: loop exit
PB: predicated region body
PF: predicated region fallthrough
CT: control target
= control target key end

     0   :  { %8 = vsyncpa [#allocation3], 0  ;;  %s1216_s12 = smov [#allocation2]   ;;  %s1376_s0 = inlined_call_operand.vmem [shape: f32[16,8], index: 0, kind: input, shape index: {}]   ;;  %s1377_s1 = inlined_call_operand.hbm [shape: f32[264,128], index: 1, kind: input, shape index: {}]   ;;  %s1378_s2 = inlined_call_operand.vmem [shape: f32[24,128], index: 2, kind: input, shape index: {}]   ;;  %s1379_s3 = inlined_call_operand.vmem [shape: f32[16,4], index: 3, kind: output, shape index: {}]  }
   0x1   :  { %s16_s13 = sshll.u32 %s1216_s12, 4  ;;  %s1192_s16 = scalar_lea.hbm %s1377_s1, 4224  ;;  %s17_s13 = int_to_ptr.vmem [resolvable:$true] %s16_s13 }
   0x2   :  { %p1193_p0 = scmp.ne.s32.totalorder %s1377_s1, %s1192_s16  ;;  %p1196_p1 = scmp.lt.u32.totalorder %s1192_s16, %s1377_s1 }
   0x4   :  { %p1198_p2 = pnand %p1196_p1, %p1193_p0 }
   0x6   :  { %1201 = shalt.err (!%p1198_p2)
}
   0x7   :  { %s1202_s21 = scalar_lea.vmem %s17_s13, 4224  ;;  %p1207_p4 = scmp.lt.s32.totalorder %s17_s13, %s17_s13 }
   0x8   :  { %p1203_p3 = scmp.ne.s32.totalorder %s17_s13, %s1202_s21  ;;  %p1208_p5 = scmp.lt.s32.totalorder %s1202_s21, %s1202_s21 }
   0xa   :  { %p1209_p6 = por %p1208_p5, %p1207_p4 }
   0xc   :  { %p1210_p7 = pnand %p1209_p6, %p1203_p3 }
   0xe   :  { %1213 = shalt.err (!%p1210_p7)
}
   0xf   :  { %s1217_s22 = smov 128   ;;  %s1218_s23 = smov 8  }
  0x10   :  { %22 = dma.hbm_to_vmem [thread:$0]  %s1377_s1, 4224, %s17_s13, [#allocation3], %s1217_s22, %s1217_s22, %s1218_s23  }
  0x11   :  { %1214 = dma.done.wait [#allocation3], 4224  }
  0x12   :  { %1215 = vsyncadd [#allocation3], 4294963072  ;;  %vm36_vm0 = vcmask 64512   ;;  %v30_v0 = vld [vmem:[#allocation2] sm:$0xff]  ;;  %v28_v1 = vld [vmem:[%s1376_s0] sm:$0xff]  ;;  %vm129_vm1 = vcmask 261120  }
  0x13   :  { %v29_v2 = vld [vmem:[%s1376_s0 + $0x8] sm:$0xff]  ;;  %1016 = vmatprep.subr.mxu0 %v30_v0  ;;  %1018 = vmatprep.mubr.msk.f32.mxu0 %vm36_vm0, %v28_v1  ;;  %v120_v3 = vld [vmem:[#allocation2 + $0x8] sm:$0xff]  ;;  %v122_v6 = vld [vmem:[#allocation2 + $0x18] sm:$0xff]  ;;  %vm213_vm2 = vcmask 523264   ;;  %s1219_s11 = smov 64   ;;  %s1220_s24 = smov 96  }
  0x14   :  { %v121_v4 = vld [vmem:[#allocation2 + $0x10] sm:$0xff]  ;;  %1017 = vmatpush3.msra.mxu0 %v30_v0  ;;  %v123_v7 = vld [vmem:[#allocation2 + $0x20] sm:$0xff]  ;;  %v938_v9 = vld [vmem:[%s1378_s2] ss:$0 sm:$0xff]  ;;  %vm930_vm3 = vcmask 31744  }
  0x15   :  { %v1103_v5 = vpack.c.bf16 %v121_v4, %v120_v3  ;;  %1019 = vmatmul.mubr.msk.f32.vlgmr.msra.gmra.mrb[0].mxu0 %vm36_vm0, %v29_v2  ;;  %v1107_v8 = vpack.c.bf16 %v123_v7, %v122_v6  ;;  %v941_v16 = vld [vmem:[%s1378_s2 + $0x1] ss:$0 sm:$0xff]  ;;  %v261_v28 = vld [vmem:[#allocation2 + $0x30] sm:$0xff]  ;;  %v262_v29 = vld [vmem:[#allocation2 + $0x38] sm:$0xff] }
  0x16   :  { %v260_v27 = vld [vmem:[#allocation2 + $0x28] sm:$0xff]  ;;  %v263_v31 = vld [vmem:[#allocation2 + $0x40] sm:$0xff]  ;;  %v265_v34 = vld [vmem:[#allocation2 + $0x50] sm:$0xff] }
  0x17   :  { %1104 = vmatprep.subr.bf16.mxu1 %v1103_v5  ;;  %v1111_v30 = vpack.c.bf16 %v261_v28, %v260_v27  ;;  %v1115_v32 = vpack.c.bf16 %v263_v31, %v262_v29  ;;  %v264_v33 = vld [vmem:[#allocation2 + $0x48] sm:$0xff]  ;;  %v266_v36 = vld [vmem:[#allocation2 + $0x58] sm:$0xff]  ;;  %v267_v37 = vld [vmem:[#allocation2 + $0x60] sm:$0xff] }
  0x18   :  { %1106 = vmatpush3.bf16.msra.mxu1 %v1103_v5  ;;  %v1119_v35 = vpack.c.bf16 %v265_v34, %v264_v33  ;;  %v1123_v38 = vpack.c.bf16 %v267_v37, %v266_v36  ;;  %v944_v57 = vld [vmem:[%s1378_s2 + $0x3] ss:$0 sm:$0xff]  ;;  %v945_v59 = vld [vmem:[%s1378_s2 + $0x4] ss:$0 sm:$0xff]  ;;  %v946_v5 = vld [vmem:[%s1378_s2 + $0x2] ss:$0 sm:$0xff] }
  0x19   :  { %1108 = vmatprep.subr.bf16.mxu1 %v1107_v8  ;;  %1112 = vmatprep.subr.bf16.mxu0 %v1111_v30  ;;  %v418_v27 = vld [vmem:[#allocation2 + $0x98] sm:$0xff]  ;;  %v419_v28 = vld [vmem:[#allocation2 + $0xa0] sm:$0xff] }
  0x1a   :  { %1114 = vmatpush3.bf16.msra.mxu0 %v1111_v30 }
  0x1b   :  { %1116 = vmatprep.subr.bf16.mxu0 %v1115_v32 }
  0x1c   :  { %1110 = vmatpush3.bf16.msra.mxu1 %v1107_v8 }
  0x1e   :  { %1118 = vmatpush3.bf16.msra.mxu0 %v1115_v32 }
  0x1f   :  { %1120 = vmatprep.subr.bf16.mxu0 %v1119_v35 }
  0x22   :  { %1122 = vmatpush3.bf16.msra.mxu0 %v1119_v35 }
  0x23   :  { %1124 = vmatprep.subr.bf16.mxu0 %v1123_v38 }
  0x26   :  { %1126 = vmatpush3.bf16.msra.mxu0 %v1123_v38 }
  0xe8   :  { %v1020_v10 = vpop.f32.mrb[0].mxu0 }
  0xe9   :  { %v115_v11 = vadd.f32 %v1020_v10, %v938_v9  ;;  %v109_v12 = vpop.f32.mrb[1].mxu0 }
  0xea   :  { %v110_v13 = vadd.f32 %v938_v9, %v109_v12 }
  0xeb   :  { %v119_v15 = vmax.f32 %v115_v11, 0.0 }
  0xec   :  { %v118_v14 = vmax.f32 %v110_v13, 0.0 }
  0xee   :  { %1029 = vmatprep.mubr.msk.f32.mxu1 %vm129_vm1, %v118_v14 }
  0xef   :  { %1030 = vmatmul.mubr.msk.f32.vlgmr.msra.gmra.mrb[0].mxu1 %vm129_vm1, %v119_v15 }
 0x1c2   :  { %v1031_v17 = vpop.f32.mrb[0].mxu1 }
 0x1c3   :  { %v202_v18 = vpop.f32.mrb[1].mxu1  ;;  %v1267_v19 = vadd.f32 %v1031_v17, %v941_v16  ;;  %v413_v17 = vld [vmem:[#allocation2 + $0x70] sm:$0xff] }
 0x1c4   :  { %v1269_v20 = vadd.f32 %v941_v16, %v202_v18  ;;  %v412_v16 = vld [vmem:[#allocation2 + $0x68] sm:$0xff] }
 0x1c5   :  { %v221_v24 = vmul.f32 %v1267_v19, %v1267_v19  ;;  %v217_v25 = vsel %vm213_vm2, %v1267_v19, 0.0  ;;  %v1127_v18 = vpack.c.bf16 %v413_v17, %v412_v16 }
 0x1c6   :  { %v214_v21 = vsel %vm213_vm2, %v1269_v20, 0.0  ;;  %v220_v22 = vmul.f32 %v1269_v20, %v1269_v20 }
 0x1c7   :  { %215 = vadd.xlane.f32.xlu0 %v214_v21  ;;  %v225_v26 = vsel %vm213_vm2, %v221_v24, 0.0  ;;  %1128 = vmatprep.subr.bf16.mxu1 %v1127_v18  ;;  %v414_v21 = vld [vmem:[#allocation2 + $0x78] sm:$0xff]  ;;  %v416_v24 = vld [vmem:[#allocation2 + $0x88] sm:$0xff] }
 0x1c8   :  { %v222_v23 = vsel %vm213_vm2, %v220_v22, 0.0  ;;  %1130 = vmatpush3.bf16.msra.mxu1 %v1127_v18  ;;  %v415_v22 = vld [vmem:[#allocation2 + $0x80] sm:$0xff] }
 0x1c9   :  { %223 = vadd.xlane.f32.xlu1 %v222_v23  ;;  %v1131_v23 = vpack.c.bf16 %v415_v22, %v414_v21 }
 0x1cb   :  { %218 = vadd.xlane.f32.xlu0 %v217_v25  ;;  %1132 = vmatprep.subr.bf16.mxu1 %v1131_v23  ;;  %v417_v25 = vld [vmem:[#allocation2 + $0x90] sm:$0xff] }
 0x1cc   :  { %1134 = vmatpush3.bf16.msra.mxu1 %v1131_v23 }
 0x1cd   :  { %226 = vadd.xlane.f32.xlu1 %v225_v26  ;;  %v1135_v26 = vpack.c.bf16 %v417_v25, %v416_v24 }
 0x1cf   :  { %1136 = vmatprep.subr.bf16.mxu1 %v1135_v26 }
 0x1d0   :  { %1138 = vmatpush3.bf16.msra.mxu1 %v1135_v26 }
 0x254   :  { %v216_v39 = vpop.xlane.xlu0 %215 }
 0x255   :  { %v228_v40 = vmul.f32 0.015625, %v216_v39 }
 0x256   :  { %v224_v41 = vpop.xlane.xlu1 %223 }
 0x257   :  { %v232_v42 = vmul.f32 %v228_v40, %v228_v40  ;;  %v230_v43 = vmul.f32 0.015625, %v224_v41  ;;  %v238_v55 = vsub.f32 %v1269_v20, %v228_v40 }
 0x258   :  { %v219_v44 = vpop.xlane.xlu0 %218 }
 0x259   :  { %v234_v45 = vsub.f32 %v230_v43, %v232_v42  ;;  %v229_v46 = vmul.f32 0.015625, %v219_v44 }
 0x25a   :  { %v227_v47 = vpop.xlane.xlu1 %226 }
 0x25b   :  { %v236_v48 = vmax.f32 %v234_v45, 0.0  ;;  %v233_v49 = vmul.f32 %v229_v46, %v229_v46  ;;  %v231_v50 = vmul.f32 0.015625, %v227_v47  ;;  %v239_v60 = vsub.f32 %v1267_v19, %v229_v46  ;;  %v949_v47 = vld [vmem:[%s1378_s2 + $0x5] ss:$0 sm:$0xff] }
 0x25d   :  { %v240_v51 = vadd.f32 1e-05, %v236_v48  ;;  %v235_v52 = vsub.f32 %v231_v50, %v233_v49  ;;  %v950_v50 = vld [vmem:[%s1378_s2 + $0x6] ss:$0 sm:$0xff] }
 0x25f   :  { %1172 = vrsqrt.f32 %v240_v51  ;;  %v237_v53 = vmax.f32 %v235_v52, 0.0 }
 0x261   :  { %v241_v54 = vadd.f32 1e-05, %v237_v53 }
 0x263   :  { %1174 = vrsqrt.f32 %v241_v54 }
 0x269   :  { %v1173_v56 = vpop.eup %1172 }
 0x26a   :  { %v244_v58 = vmul.f32 %v1173_v56, %v238_v55 }
 0x26c   :  { %v250_v61 = vmul.f32 %v944_v57, %v244_v58 }
 0x26d   :  { %v1175_v62 = vpop.eup %1174 }
 0x26e   :  { %v245_v63 = vmul.f32 %v1175_v62, %v239_v60  ;;  %v256_v0 = vadd.f32 %v945_v59, %v250_v61  ;;  %v951_v62 = vld [vmem:[%s1378_s2 + $0x7] ss:$0 sm:$0xff] }
 0x270   :  { %v251_v1 = vmul.f32 %v944_v57, %v245_v63  ;;  %v258_v2 = vmax.f32 %v256_v0, 0.0 }
 0x272   :  { %v257_v3 = vadd.f32 %v945_v59, %v251_v1  ;;  %1048 = vmatprep.mubr.msk.f32.mxu0 %vm213_vm2, %v258_v2 }
 0x274   :  { %v259_v4 = vmax.f32 %v257_v3, 0.0 }
 0x276   :  { %1049 = vmatmul.mubr.msk.f32.vlgmr.msra.gmra.mrb[2].mxu0 %vm213_vm2, %v259_v4 }
 0x349   :  { %v1050_v6 = vpop.f32.mrb[2].mxu0 }
 0x34a   :  { %v351_v7 = vadd.f32 %v1050_v6, %v946_v5  ;;  %v345_v8 = vpop.f32.mrb[3].mxu0 }
 0x34b   :  { %v346_v9 = vadd.f32 %v946_v5, %v345_v8 }
 0x34c   :  { %v359_v10 = vsel %vm213_vm2, %v351_v7, 0.0  ;;  %v363_v11 = vmul.f32 %v351_v7, %v351_v7 }
 0x34d   :  { %360 = vadd.xlane.f32.xlu1 %v359_v10  ;;  %v356_v12 = vsel %vm213_vm2, %v346_v9, 0.0  ;;  %v362_v13 = vmul.f32 %v346_v9, %v346_v9  ;;  %v555_v10 = vld [vmem:[#allocation2 + $0xb0] sm:$0xff] }
 0x34e   :  { %357 = vadd.xlane.f32.xlu0 %v356_v12  ;;  %v367_v14 = vsel %vm213_vm2, %v363_v11, 0.0  ;;  %v556_v11 = vld [vmem:[#allocation2 + $0xb8] sm:$0xff] }
 0x34f   :  { %v364_v15 = vsel %vm213_vm2, %v362_v13, 0.0  ;;  %v557_v13 = vld [vmem:[#allocation2 + $0xc0] sm:$0xff] }
 0x351   :  { %368 = vadd.xlane.f32.xlu1 %v367_v14  ;;  %v1147_v14 = vpack.c.bf16 %v557_v13, %v556_v11 }
 0x352   :  { %365 = vadd.xlane.f32.xlu0 %v364_v15 }
 0x362   :  { %404 = vrot.lane.b32.xlu1 %v1267_v19, %s1219_s11  ;;  %v1139_v19 = vpack.c.bf16 %v419_v28, %v418_v27 }
 0x364   :  { %1140 = vmatprep.subr.bf16.mxu1 %v1139_v19 }
 0x365   :  { %1142 = vmatpush3.bf16.msra.mxu1 %v1139_v19 }
 0x368   :  { %402 = vrot.lane.b32.xlu0 %v1269_v20, %s1219_s11 }
 0x3da   :  { %v361_v20 = vpop.xlane.xlu1 %360 }
 0x3db   :  { %v371_v29 = vmul.f32 0.015625, %v361_v20  ;;  %v358_v30 = vpop.xlane.xlu0 %357 }
 0x3dc   :  { %v370_v31 = vmul.f32 0.015625, %v358_v30 }
 0x3dd   :  { %v375_v33 = vmul.f32 %v371_v29, %v371_v29  ;;  %v381_v44 = vsub.f32 %v351_v7, %v371_v29 }
 0x3de   :  { %v369_v32 = vpop.xlane.xlu1 %368  ;;  %v374_v36 = vmul.f32 %v370_v31, %v370_v31  ;;  %v380_v46 = vsub.f32 %v346_v9, %v370_v31  ;;  %v554_v9 = vld [vmem:[#allocation2 + $0xa8] sm:$0xff] }
 0x3df   :  { %v373_v34 = vmul.f32 0.015625, %v369_v32  ;;  %v366_v35 = vpop.xlane.xlu0 %365  ;;  %v1143_v12 = vpack.c.bf16 %v555_v10, %v554_v9 }
 0x3e0   :  { %v372_v37 = vmul.f32 0.015625, %v366_v35 }
 0x3e1   :  { %v377_v38 = vsub.f32 %v373_v34, %v375_v33  ;;  %1144 = vmatprep.subr.bf16.mxu0 %v1143_v12  ;;  %v954_v34 = vld [vmem:[%s1378_s2 + $0x9] ss:$0 sm:$0xff] }
 0x3e2   :  { %v376_v39 = vsub.f32 %v372_v37, %v374_v36  ;;  %v405_v55 = vpop.permute.xlu1 %404  ;;  %1146 = vmatpush3.bf16.msra.mxu0 %v1143_v12  ;;  %v955_v37 = vld [vmem:[%s1378_s2 + $0xa] ss:$0 sm:$0xff] }
 0x3e3   :  { %v379_v40 = vmax.f32 %v377_v38, 0.0  ;;  %v403_v58 = vpop.permute.xlu0 %402  ;;  %1148 = vmatprep.subr.bf16.mxu0 %v1147_v14 }
 0x3e4   :  { %v378_v41 = vmax.f32 %v376_v39, 0.0 }
 0x3e5   :  { %v383_v42 = vadd.f32 1e-05, %v379_v40 }
 0x3e6   :  { %v382_v43 = vadd.f32 1e-05, %v378_v41  ;;  %1150 = vmatpush3.bf16.msra.mxu0 %v1147_v14 }
 0x3e7   :  { %1176 = vrsqrt.f32 %v383_v42 }
 0x3e8   :  { %1178 = vrsqrt.f32 %v382_v43 }
 0x3f1   :  { %v1177_v45 = vpop.eup %1176 }
 0x3f2   :  { %v1179_v48 = vpop.eup %1178  ;;  %v387_v49 = vmul.f32 %v1177_v45, %v381_v44  ;;  %v956_v45 = vld [vmem:[%s1378_s2 + $0x8] ss:$0 sm:$0xff] }
 0x3f3   :  { %v386_v51 = vmul.f32 %v1179_v48, %v380_v46 }
 0x3f4   :  { %v393_v52 = vmul.f32 %v949_v47, %v387_v49 }
 0x3f5   :  { %v392_v53 = vmul.f32 %v949_v47, %v386_v51 }
 0x3f6   :  { %v399_v54 = vadd.f32 %v950_v50, %v393_v52 }
 0x3f7   :  { %v398_v56 = vadd.f32 %v950_v50, %v392_v53 }
 0x3f8   :  { %v409_v57 = vadd.f32 %v405_v55, %v399_v54 }
 0x3f9   :  { %v408_v59 = vadd.f32 %v403_v58, %v398_v56  ;;  %v702_v56 = vld [vmem:[#allocation2 + $0xc8] sm:$0xff] }
 0x3fa   :  { %v411_v61 = vmax.f32 %v409_v57, 0.0  ;;  %v703_v57 = vld [vmem:[#allocation2 + $0xd0] sm:$0xff] }
 0x3fb   :  { %v410_v60 = vmax.f32 %v408_v59, 0.0  ;;  %v1151_v58 = vpack.c.bf16 %v703_v57, %v702_v56  ;;  %v704_v59 = vld [vmem:[#allocation2 + $0xd8] sm:$0xff] }
 0x3fd   :  { %1067 = vmatprep.mubr.msk.f32.mxu1 %vm213_vm2, %v410_v60  ;;  %1152 = vmatprep.subr.bf16.mxu1 %v1151_v58  ;;  %v705_v60 = vld [vmem:[#allocation2 + $0xe0] sm:$0xff] }
 0x3fe   :  { %1068 = vmatmul.mubr.msk.f32.vlgmr.msra.gmra.mrb[2].mxu1 %vm213_vm2, %v411_v61  ;;  %v1155_v61 = vpack.c.bf16 %v705_v60, %v704_v59 }
 0x3ff   :  { %1154 = vmatpush3.bf16.msra.mxu1 %v1151_v58 }
 0x400   :  { %1156 = vmatprep.subr.bf16.mxu1 %v1155_v61 }
 0x403   :  { %1158 = vmatpush3.bf16.msra.mxu1 %v1155_v61 }
 0x4d1   :  { %v1069_v63 = vpop.f32.mrb[2].mxu1 }
 0x4d2   :  { %v1311_v0 = vadd.f32 %v1069_v63, %v951_v62  ;;  %v497_v1 = vpop.f32.mrb[3].mxu1 }
 0x4d3   :  { %v1313_v2 = vadd.f32 %v951_v62, %v497_v1 }
 0x4d4   :  { %v511_v3 = vsel %vm129_vm1, %v1311_v0, 0.0  ;;  %v515_v6 = vmul.f32 %v1311_v0, %v1311_v0 }
 0x4d5   :  { %512 = vadd.xlane.f32.xlu0 %v511_v3  ;;  %v508_v4 = vsel %vm129_vm1, %v1313_v2, 0.0  ;;  %v514_v5 = vmul.f32 %v1313_v2, %v1313_v2 }
 0x4d6   :  { %509 = vadd.xlane.f32.xlu1 %v508_v4  ;;  %v519_v8 = vsel %vm129_vm1, %v515_v6, 0.0 }
 0x4d7   :  { %v516_v7 = vsel %vm129_vm1, %v514_v5, 0.0 }
 0x4d9   :  { %517 = vadd.xlane.f32.xlu0 %v516_v7 }
 0x4da   :  { %520 = vadd.xlane.f32.xlu1 %v519_v8 }
 0x562   :  { %v513_v15 = vpop.xlane.xlu0 %512 }
 0x563   :  { %v510_v16 = vpop.xlane.xlu1 %509  ;;  %v523_v17 = vmul.f32 0.03125, %v513_v15 }
 0x564   :  { %v522_v18 = vmul.f32 0.03125, %v510_v16 }
 0x565   :  { %v527_v25 = vmul.f32 %v523_v17, %v523_v17  ;;  %v533_v33 = vsub.f32 %v1311_v0, %v523_v17  ;;  %v959_v17 = vld [vmem:[%s1378_s2 + $0xb] ss:$0 sm:$0xff] }
 0x566   :  { %v526_v21 = vmul.f32 %v522_v18, %v522_v18  ;;  %v518_v22 = vpop.xlane.xlu0 %517  ;;  %v532_v31 = vsub.f32 %v1313_v2, %v522_v18 }
 0x567   :  { %v524_v23 = vmul.f32 0.03125, %v518_v22  ;;  %v521_v24 = vpop.xlane.xlu1 %520  ;;  %v960_v22 = vld [vmem:[%s1378_s2 + $0xc] ss:$0 sm:$0xff] }
 0x568   :  { %v525_v26 = vmul.f32 0.03125, %v521_v24 }
 0x569   :  { %v528_v27 = vsub.f32 %v524_v23, %v526_v21 }
 0x56a   :  { %v529_v28 = vsub.f32 %v525_v26, %v527_v25 }
 0x56b   :  { %v530_v19 = vmax.f32 %v528_v27, 0.0 }
 0x56c   :  { %v531_v20 = vmax.f32 %v529_v28, 0.0 }
 0x56d   :  { %v534_v29 = vadd.f32 1e-05, %v530_v19 }
 0x56e   :  { %v535_v30 = vadd.f32 1e-05, %v531_v20 }
 0x56f   :  { %1180 = vrsqrt.f32 %v534_v29 }
 0x570   :  { %1182 = vrsqrt.f32 %v535_v30 }
 0x579   :  { %v1181_v32 = vpop.eup %1180 }
 0x57a   :  { %v1183_v35 = vpop.eup %1182  ;;  %v538_v36 = vmul.f32 %v1181_v32, %v532_v31  ;;  %v961_v32 = vld [vmem:[%s1378_s2 + $0xd] ss:$0 sm:$0xff] }
 0x57b   :  { %v539_v38 = vmul.f32 %v1183_v35, %v533_v33 }
 0x57c   :  { %v544_v39 = vmul.f32 %v954_v34, %v538_v36 }
 0x57d   :  { %v545_v40 = vmul.f32 %v954_v34, %v539_v38 }
 0x57e   :  { %v550_v41 = vadd.f32 %v955_v37, %v544_v39 }
 0x57f   :  { %v551_v42 = vadd.f32 %v955_v37, %v545_v40 }
 0x580   :  { %v552_v43 = vmax.f32 %v550_v41, 0.0 }
 0x581   :  { %v553_v44 = vmax.f32 %v551_v42, 0.0 }
 0x582   :  { %1078 = vmatprep.mubr.msk.f32.mxu0 %vm129_vm1, %v552_v43  ;;  %v840_v43 = vld [vmem:[#allocation2 + $0xe8] sm:$0xff] }
 0x583   :  { %1079 = vmatmul.mubr.msk.f32.vlgmr.msra.gmra.mrb[4].mxu0 %vm129_vm1, %v553_v44  ;;  %v841_v44 = vld [vmem:[#allocation2 + $0xf0] sm:$0xff] }
 0x656   :  { %v1080_v46 = vpop.f32.mrb[4].mxu0 }
 0x657   :  { %v641_v47 = vadd.f32 %v1080_v46, %v956_v45  ;;  %v635_v48 = vpop.f32.mrb[5].mxu0  ;;  %v1159_v46 = vpack.c.bf16 %v841_v44, %v840_v43 }
 0x658   :  { %v636_v49 = vadd.f32 %v956_v45, %v635_v48  ;;  %v842_v45 = vld [vmem:[#allocation2 + $0xf8] sm:$0xff] }
 0x659   :  { %v649_v50 = vsel %vm129_vm1, %v641_v47, 0.0  ;;  %v653_v51 = vmul.f32 %v641_v47, %v641_v47  ;;  %1160 = vmatprep.subr.bf16.mxu0 %v1159_v46 }
 0x65a   :  { %650 = vadd.xlane.f32.xlu1 %v649_v50  ;;  %v646_v52 = vsel %vm129_vm1, %v636_v49, 0.0  ;;  %v652_v53 = vmul.f32 %v636_v49, %v636_v49  ;;  %1162 = vmatpush3.bf16.msra.mxu0 %v1159_v46 }
 0x65b   :  { %647 = vadd.xlane.f32.xlu0 %v646_v52  ;;  %v657_v54 = vsel %vm129_vm1, %v653_v51, 0.0 }
 0x65c   :  { %v654_v55 = vsel %vm129_vm1, %v652_v53, 0.0 }
 0x65e   :  { %658 = vadd.xlane.f32.xlu1 %v657_v54 }
 0x65f   :  { %655 = vadd.xlane.f32.xlu0 %v654_v55 }
 0x66f   :  { %694 = vrot.lane.b32.xlu1 %v1311_v0, %s1220_s24 }
 0x675   :  { %692 = vrot.lane.b32.xlu0 %v1313_v2, %s1220_s24 }
 0x6e7   :  { %v651_v62 = vpop.xlane.xlu1 %650 }
 0x6e8   :  { %v661_v63 = vmul.f32 0.03125, %v651_v62  ;;  %v648_v1 = vpop.xlane.xlu0 %647 }
 0x6e9   :  { %v660_v3 = vmul.f32 0.03125, %v648_v1 }
 0x6ea   :  { %v665_v5 = vmul.f32 %v661_v63, %v661_v63  ;;  %v671_v14 = vsub.f32 %v641_v47, %v661_v63  ;;  %v843_v47 = vld [vmem:[#allocation2 + $0x100] sm:$0xff] }
 0x6eb   :  { %v659_v4 = vpop.xlane.xlu1 %658  ;;  %v664_v7 = vmul.f32 %v660_v3, %v660_v3  ;;  %v670_v16 = vsub.f32 %v636_v49, %v660_v3  ;;  %v1163_v48 = vpack.c.bf16 %v843_v47, %v842_v45 }
 0x6ec   :  { %v663_v6 = vmul.f32 0.03125, %v659_v4  ;;  %v656_v0 = vpop.xlane.xlu0 %655 }
 0x6ed   :  { %v662_v2 = vmul.f32 0.03125, %v656_v0  ;;  %1164 = vmatprep.subr.bf16.mxu0 %v1163_v48 }
 0x6ee   :  { %v667_v8 = vsub.f32 %v663_v6, %v665_v5  ;;  %1166 = vmatpush3.bf16.msra.mxu0 %v1163_v48  ;;  %v964_v6 = vld [vmem:[%s1378_s2 + $0xe] ss:$0 sm:$0xff] }
 0x6ef   :  { %v666_v9 = vsub.f32 %v662_v2, %v664_v7  ;;  %v695_v27 = vpop.permute.xlu1 %694  ;;  %v965_v2 = vld [vmem:[%s1378_s2 + $0xf] ss:$0 sm:$0xff] }
 0x6f0   :  { %v669_v10 = vmax.f32 %v667_v8, 0.0  ;;  %v693_v20 = vpop.permute.xlu0 %692 }
 0x6f1   :  { %v668_v11 = vmax.f32 %v666_v9, 0.0 }
 0x6f2   :  { %v673_v12 = vadd.f32 1e-05, %v669_v10 }
 0x6f3   :  { %v672_v13 = vadd.f32 1e-05, %v668_v11 }
 0x6f4   :  { %1184 = vrsqrt.f32 %v673_v12 }
 0x6f5   :  { %1186 = vrsqrt.f32 %v672_v13 }
 0x6fe   :  { %v1185_v15 = vpop.eup %1184 }
 0x6ff   :  { %v1187_v18 = vpop.eup %1186  ;;  %v677_v21 = vmul.f32 %v1185_v15, %v671_v14  ;;  %v966_v15 = vld [vmem:[%s1378_s2 + $0x10] ss:$0 sm:$0xff] }
 0x700   :  { %v676_v23 = vmul.f32 %v1187_v18, %v670_v16 }
 0x701   :  { %v683_v24 = vmul.f32 %v959_v17, %v677_v21 }
 0x702   :  { %v682_v25 = vmul.f32 %v959_v17, %v676_v23 }
 0x703   :  { %v689_v26 = vadd.f32 %v960_v22, %v683_v24 }
 0x704   :  { %v688_v28 = vadd.f32 %v960_v22, %v682_v25 }
 0x705   :  { %v699_v19 = vadd.f32 %v695_v27, %v689_v26 }
 0x706   :  { %v698_v29 = vadd.f32 %v693_v20, %v688_v28 }
 0x707   :  { %v701_v31 = vmax.f32 %v699_v19, 0.0 }
 0x708   :  { %v700_v30 = vmax.f32 %v698_v29, 0.0 }
 0x70a   :  { %1089 = vmatprep.mubr.msk.f32.mxu1 %vm129_vm1, %v700_v30 }
 0x70b   :  { %1090 = vmatmul.mubr.msk.f32.vlgmr.msra.gmra.mrb[4].mxu1 %vm129_vm1, %v701_v31 }
 0x7de   :  { %v1091_v33 = vpop.f32.mrb[4].mxu1 }
 0x7df   :  { %v789_v34 = vadd.f32 %v1091_v33, %v961_v32  ;;  %v783_v35 = vpop.f32.mrb[5].mxu1 }
 0x7e0   :  { %v784_v36 = vadd.f32 %v961_v32, %v783_v35 }
 0x7e1   :  { %v797_v37 = vsel %vm129_vm1, %v789_v34, 0.0  ;;  %v801_v40 = vmul.f32 %v789_v34, %v789_v34 }
 0x7e2   :  { %798 = vadd.xlane.f32.xlu0 %v797_v37  ;;  %v794_v38 = vsel %vm129_vm1, %v784_v36, 0.0  ;;  %v800_v39 = vmul.f32 %v784_v36, %v784_v36 }
 0x7e3   :  { %795 = vadd.xlane.f32.xlu1 %v794_v38  ;;  %v805_v42 = vsel %vm129_vm1, %v801_v40, 0.0 }
 0x7e4   :  { %v802_v41 = vsel %vm129_vm1, %v800_v39, 0.0 }
 0x7e6   :  { %803 = vadd.xlane.f32.xlu0 %v802_v41 }
 0x7e7   :  { %806 = vadd.xlane.f32.xlu1 %v805_v42 }
 0x86f   :  { %v799_v49 = vpop.xlane.xlu0 %798 }
 0x870   :  { %v796_v50 = vpop.xlane.xlu1 %795  ;;  %v809_v51 = vmul.f32 0.03125, %v799_v49 }
 0x871   :  { %v808_v52 = vmul.f32 0.03125, %v796_v50 }
 0x872   :  { %v813_v57 = vmul.f32 %v809_v51, %v809_v51  ;;  %v819_v5 = vsub.f32 %v789_v34, %v809_v51 }
 0x873   :  { %v812_v53 = vmul.f32 %v808_v52, %v808_v52  ;;  %v804_v54 = vpop.xlane.xlu0 %803  ;;  %v818_v3 = vsub.f32 %v784_v36, %v808_v52 }
 0x874   :  { %v810_v55 = vmul.f32 0.03125, %v804_v54  ;;  %v807_v56 = vpop.xlane.xlu1 %806 }
 0x875   :  { %v811_v58 = vmul.f32 0.03125, %v807_v56 }
 0x876   :  { %v814_v59 = vsub.f32 %v810_v55, %v812_v53 }
 0x877   :  { %v815_v60 = vsub.f32 %v811_v58, %v813_v57 }
 0x878   :  { %v816_v61 = vmax.f32 %v814_v59, 0.0 }
 0x879   :  { %v817_v62 = vmax.f32 %v815_v60, 0.0 }
 0x87a   :  { %v820_v63 = vadd.f32 1e-05, %v816_v61 }
 0x87b   :  { %v821_v1 = vadd.f32 1e-05, %v817_v62 }
 0x87c   :  { %1188 = vrsqrt.f32 %v820_v63 }
 0x87d   :  { %1190 = vrsqrt.f32 %v821_v1 }
 0x886   :  { %v1189_v4 = vpop.eup %1188 }
 0x887   :  { %v1191_v0 = vpop.eup %1190  ;;  %v824_v7 = vmul.f32 %v1189_v4, %v818_v3 }
 0x888   :  { %v825_v8 = vmul.f32 %v1191_v0, %v819_v5 }
 0x889   :  { %v830_v9 = vmul.f32 %v964_v6, %v824_v7 }
 0x88a   :  { %v831_v10 = vmul.f32 %v964_v6, %v825_v8 }
 0x88b   :  { %v836_v11 = vadd.f32 %v965_v2, %v830_v9 }
 0x88c   :  { %v837_v12 = vadd.f32 %v965_v2, %v831_v10 }
 0x88d   :  { %v838_v13 = vmax.f32 %v836_v11, 0.0 }
 0x88e   :  { %v839_v14 = vmax.f32 %v837_v12, 0.0 }
 0x88f   :  { %1100 = vmatprep.mubr.msk.f32.mxu0 %vm129_vm1, %v838_v13 }
 0x890   :  { %1101 = vmatmul.mubr.msk.f32.vlgmr.msra.gmra.mrb[6].mxu0 %vm129_vm1, %v839_v14 }
 0x963   :  { %v1102_v16 = vpop.f32.mrb[6].mxu0 }
 0x964   :  { %v927_v17 = vadd.f32 %v1102_v16, %v966_v15  ;;  %v921_v18 = vpop.f32.mrb[7].mxu0 }
 0x965   :  { %v922_v21 = vadd.f32 %v966_v15, %v921_v18 }
 0x966   :  { %932 = vst.msk [vmem:[%s1379_s3 + $0x8] sm:$0xff] %vm930_vm3, %v927_v17 }
 0x967   :  { %931 = vst.msk [vmem:[%s1379_s3] sm:$0xff] %vm930_vm3, %v922_v21 }
 0x968   :  { %937 = vsyncpa [#allocation3], 1 }

</bundles_post_ra>
